<compile_context>
chip_gen: v7x
topology: tpu7x:2x2x1
jax: 0.10.0
libtpu: 0.0.40
codegen_flags: <defaults>
</compile_context>

<pallas_src>
import jax
import jax.numpy as jnp
from jax.experimental import pallas as pl
from jax.experimental.pallas import tpu as pltpu


LANE = 128
SUBLANE = 8
MAX_TILE_B = 512        # bf16/int32 tiles stay well under scoped VMEM on all chips
MIN_GRID_STEPS = 2      # let v7x's two TensorCores both get a tile when B allows


def _round_up(n, m):
    return ((n + m - 1) // m) * m


def _pad2(a, rows, cols):
    r, c = a.shape
    if r == rows and c == cols:
        return a
    return jnp.pad(a, ((0, rows - r), (0, cols - c)))


def _pick_tile_b(batch, max_tile=MAX_TILE_B, min_steps=MIN_GRID_STEPS):
    """Batch tile that minimizes padding and gives >= min_steps grid steps
    whenever the batch is large enough to split (v7x 2-TC sharding)."""
    n_steps = max(pl.cdiv(batch, max_tile), min_steps)
    return max(SUBLANE, _round_up(pl.cdiv(batch, n_steps), SUBLANE))


# ----------------------------------------------------------------------------
# Kernel factory: one-hot-fused MLP chain.
#   refs = (idx, w1r, b1, [w, b] * n_dense, out)
# Layer 1 builds the one-hot in-kernel: for each class c the 0/1 mask
# (idx == c) of shape (tile_b, HW) is matmul'd against w1r[c] (HW, hid) and
# accumulated in f32 -- numerically identical to onehot(idx) @ W1, but the HBM
# input is 4 B/pixel of indices instead of a dense one-hot.
# Dense layers run bf16 x bf16 on the MXU with f32 accumulation; bias/ReLU f32.
# ----------------------------------------------------------------------------
def _make_onehot_mlp_kernel(n_classes, relu_after, n_dense):

    def kernel(idx_ref, w1_ref, b1_ref, *rest):
        o_ref = rest[-1]
        dense = rest[:-1]

        idx = idx_ref[...]                                     # (tile_b, hw_p) int32
        acc = jnp.zeros((idx.shape[0], w1_ref.shape[2]), jnp.float32)
        for c in range(n_classes):                             # one-hot layer, fused
            mask = jnp.where(idx == c, 1.0, 0.0).astype(jnp.bfloat16)
            acc += jnp.dot(mask, w1_ref[c], preferred_element_type=jnp.float32)
        acc += b1_ref[...]
        if relu_after[0]:
            acc = jnp.maximum(acc, 0.0)

        for li in range(n_dense):
            w = dense[2 * li][...]                             # bf16 (kin, kout)
            b = dense[2 * li + 1][...]                         # f32  (1, kout)
            acc = jnp.dot(acc.astype(jnp.bfloat16), w,
                          preferred_element_type=jnp.float32) + b
            if relu_after[li + 1]:
                acc = jnp.maximum(acc, 0.0)

        o_ref[...] = acc.astype(o_ref.dtype)                   # bf16 store (lane-dense)

    return kernel


# ----------------------------------------------------------------------------
# Wrapper: batch-tiled grid, VMEM-resident weights, bf16 lane-dense output.
#   idx:          (B, HW) int class indices (post LANDFIRE remapping)
#   layer1:       (w1r (C, hw_p, hid_p) bf16, b1 (1, hid_p) f32)
#   dense_layers: [(w (kin, kout) bf16, b (1, kout) f32), ...]
# Returns bf16 (B, out_dim_padded); caller slices to the logical width.
# ----------------------------------------------------------------------------
def onehot_mlp_forward(idx, layer1, dense_layers, relu_after, *,
                       out_dtype=jnp.bfloat16, max_tile_b=MAX_TILE_B):
    B, hw = idx.shape
    w1r, b1 = layer1
    n_classes, hw_p, hid_p = w1r.shape
    assert hw_p >= hw
    out_dim = dense_layers[-1][0].shape[1] if dense_layers else hid_p
    assert len(relu_after) == len(dense_layers) + 1

    tile_b = _pick_tile_b(B, max_tile_b)
    b_pad = _round_up(B, tile_b)

    idx_p = idx.astype(jnp.int32)
    if b_pad != B or hw_p != hw:
        # pad with -1: matches no class, so padded pixels/rows contribute zeros
        idx_p = jnp.pad(idx_p, ((0, b_pad - B), (0, hw_p - hw)), constant_values=-1)

    grid = (b_pad // tile_b,)
    kernel = _make_onehot_mlp_kernel(n_classes, tuple(relu_after), len(dense_layers))

    # constant index_maps -> weights/biases stay VMEM-resident across grid steps
    in_specs = [
        pl.BlockSpec((tile_b, hw_p), lambda i: (i, 0)),              # idx (streamed)
        pl.BlockSpec((n_classes, hw_p, hid_p), lambda i: (0, 0, 0)),  # w1r (resident)
        pl.BlockSpec((1, hid_p), lambda i: (0, 0)),                  # b1  (resident)
    ]
    flat_params = [w1r, b1]
    flops = 2 * b_pad * n_classes * hw_p * hid_p
    for w, b in dense_layers:
        kin, kout = w.shape
        in_specs.append(pl.BlockSpec((kin, kout), lambda i: (0, 0)))
        in_specs.append(pl.BlockSpec((1, kout), lambda i: (0, 0)))
        flat_params += [w, b]
        flops += 2 * b_pad * kin * kout

    bytes_accessed = int(
        b_pad * hw_p * 4
        + sum(int(p.size) * jnp.dtype(p.dtype).itemsize for p in flat_params)
        + b_pad * out_dim * jnp.dtype(out_dtype).itemsize
    )

    out = pl.pallas_call(
        kernel,
        out_shape=jax.ShapeDtypeStruct((b_pad, out_dim), out_dtype),
        grid_spec=pltpu.PrefetchScalarGridSpec(
            num_scalar_prefetch=0,
            grid=grid,
            in_specs=in_specs,
            out_specs=pl.BlockSpec((tile_b, out_dim), lambda i: (i, 0)),
        ),
        compiler_params=pltpu.CompilerParams(
            dimension_semantics=("parallel",),
            vmem_limit_bytes=32 * 1024 * 1024,
        ),
        cost_estimate=pl.CostEstimate(
            flops=int(flops), transcendentals=0, bytes_accessed=bytes_accessed),
    )(idx_p, *flat_params)
    return out[:B]


# ----------------------------------------------------------------------------
# Module-equivalent wrapper
# ----------------------------------------------------------------------------
class FuelAutoencoder:
    """JAX/Pallas equivalent of fuel_autoencoder.forward().

    The injected encoder/decoder are deterministic 2-layer MLPs acting on the
    flattened (B, H*W*n_classes) one-hot fuel map.  forward() takes the class-
    index image (B, H*W) produced by process_data_batch's remapping step; the
    F.one_hot is fused into the first kernel layer (numerically identical)."""

    def __init__(self, n_classes, hw, hidden_dim, latent_dim, key):
        self.n_classes = n_classes
        self.hw = hw
        self.in_dim = hw * n_classes
        self.hidden_dim = hidden_dim
        self.latent_dim = latent_dim
        self.hw_p = _round_up(hw, LANE)
        self.hid_p = _round_up(hidden_dim, LANE)
        self.lat_p = _round_up(latent_dim, LANE)
        self.in_p = _round_up(self.in_dim, LANE)

        k1, k2, k3, k4 = jax.random.split(key, 4)
        s = 0.02
        # logical f32 parameters (the "module state")
        self.enc_w1 = (s * jax.random.normal(k1, (self.in_dim, hidden_dim))).astype(jnp.float32)
        self.enc_b1 = jnp.zeros((1, hidden_dim), jnp.float32)
        self.enc_w2 = (s * jax.random.normal(k2, (hidden_dim, latent_dim))).astype(jnp.float32)
        self.enc_b2 = jnp.zeros((1, latent_dim), jnp.float32)
        self.dec_w1 = (s * jax.random.normal(k3, (latent_dim, hidden_dim))).astype(jnp.float32)
        self.dec_b1 = jnp.zeros((1, hidden_dim), jnp.float32)
        self.dec_w2 = (s * jax.random.normal(k4, (hidden_dim, self.in_dim))).astype(jnp.float32)
        self.dec_b2 = jnp.zeros((1, self.in_dim), jnp.float32)

        # --- kernel-side parameters (lane-padded, bf16 weights / f32 biases) ---
        # layer-1 weight regrouped per class: w1r[c, hw, j] = enc_w1[hw*C + c, j]
        w1r = self.enc_w1.reshape(hw, n_classes, hidden_dim).transpose(1, 0, 2)
        w1r = jnp.pad(w1r, ((0, 0), (0, self.hw_p - hw), (0, self.hid_p - hidden_dim)))
        self._w1r = w1r.astype(jnp.bfloat16)
        self._b1 = _pad2(self.enc_b1, 1, self.hid_p)

        self._enc_w2 = _pad2(self.enc_w2, self.hid_p, self.lat_p).astype(jnp.bfloat16)
        self._enc_b2 = _pad2(self.enc_b2, 1, self.lat_p)

        # fused decode path: fold encoder-L2 into decoder-L1 (no ReLU between):
        #   Wf = W2e @ W1d ,  bf = b2e @ W1d + b1d   (fold done in f32)
        w_fold = self.enc_w2 @ self.dec_w1
        b_fold = self.enc_b2 @ self.dec_w1 + self.dec_b1
        self._w_fold = _pad2(w_fold, self.hid_p, self.hid_p).astype(jnp.bfloat16)
        self._b_fold = _pad2(b_fold, 1, self.hid_p)

        self._dec_w2 = _pad2(self.dec_w2, self.hid_p, self.in_p).astype(jnp.bfloat16)
        self._dec_b2 = _pad2(self.dec_b2, 1, self.in_p)

        self.encode_mode = True

    def encoder(self, idx):
        out = onehot_mlp_forward(
            idx, (self._w1r, self._b1),
            [(self._enc_w2, self._enc_b2)],
            relu_after=(True, False))
        return out[:, : self.latent_dim]

    def forward(self, idx):
        if self.encode_mode:
            return self.encoder(idx)
        # fused encoder+decoder: single pallas_call, all params VMEM-resident,
        # latent never round-trips through HBM, middle layers folded
        out = onehot_mlp_forward(
            idx, (self._w1r, self._b1),
            [(self._w_fold, self._b_fold), (self._dec_w2, self._dec_b2)],
            relu_after=(True, True, False))
        return out[:, : self.in_dim]


# ----------------------------------------------------------------------------
# Pure-JAX references (explicit one-hot, unfused / unfolded layers)
# ----------------------------------------------------------------------------
def _ref_mlp(x, layers_f32, relu_after, dot_dtype=jnp.bfloat16):
    acc = x.astype(jnp.float32)
    for li, (w, b) in enumerate(layers_f32):
        acc = jnp.dot(acc.astype(dot_dtype), w.astype(dot_dtype),
                      preferred_element_type=jnp.float32) + b
        if relu_after[li]:
            acc = jnp.maximum(acc, 0.0)
    return acc


if __name__ == "__main__":
    key = jax.random.PRNGKey(0)
    k_data, k_params = jax.random.split(key)

    # Shapes implied by process_data_batch: target_shape=(16,16), one-hot classes.
    B, H, W = 2, 16, 16
    N_CLASSES = 8          # small synthetic stand-in for the LANDFIRE class count
    HIDDEN = 32
    LATENT = 16
    HW = H * W
    IN_DIM = HW * N_CLASSES

    # class-index fuel map (i.e. after replace_categories; CSV remap is host-side)
    fbfm_idx = jax.random.randint(k_data, (B, HW), 0, N_CLASSES)

    model = FuelAutoencoder(N_CLASSES, HW, HIDDEN, LATENT, k_params)

    # encode_mode=True path (module default forward)
    latent = jax.block_until_ready(model.forward(fbfm_idx))
    assert latent.shape == (B, LATENT), latent.shape
    assert latent.dtype == jnp.bfloat16, latent.dtype

    # encode_mode=False path (fused encoder+decoder, single kernel launch)
    model.encode_mode = False
    recon = jax.block_until_ready(model.forward(fbfm_idx))
    assert recon.shape == (B, IN_DIM), recon.shape
    assert recon.dtype == jnp.bfloat16, recon.dtype

    # --- correctness: explicit one-hot + unfused/unfolded MLP references ------
    x_onehot = jax.nn.one_hot(fbfm_idx, N_CLASSES, dtype=jnp.float32).reshape(B, IN_DIM)
    enc_layers = [(model.enc_w1, model.enc_b1), (model.enc_w2, model.enc_b2)]
    dec_layers = [(model.dec_w1, model.dec_b1), (model.dec_w2, model.dec_b2)]

    # bf16-dot reference (mirrors the kernel's MXU numerics but unfused/unfolded)
    ref_lat_bf = _ref_mlp(x_onehot, enc_layers, (True, False))
    ref_rec_bf = _ref_mlp(ref_lat_bf, dec_layers, (True, False))
    # full-f32 reference (sanity check that bf16 drift stays small)
    ref_lat_f32 = _ref_mlp(x_onehot, enc_layers, (True, False), dot_dtype=jnp.float32)
    ref_rec_f32 = _ref_mlp(ref_lat_f32, dec_layers, (True, False), dot_dtype=jnp.float32)

    lat_f = latent.astype(jnp.float32)
    rec_f = recon.astype(jnp.float32)

    assert jnp.allclose(lat_f, ref_lat_bf, atol=2e-3, rtol=2e-2), (
        float(jnp.max(jnp.abs(lat_f - ref_lat_bf))))
    assert jnp.allclose(rec_f, ref_rec_bf, atol=5e-4, rtol=5e-2), (
        float(jnp.max(jnp.abs(rec_f - ref_rec_bf))))
    assert jnp.allclose(lat_f, ref_lat_f32, atol=5e-3, rtol=1e-1), (
        float(jnp.max(jnp.abs(lat_f - ref_lat_f32))))
    assert jnp.allclose(rec_f, ref_rec_f32, atol=2e-3, rtol=1e-1), (
        float(jnp.max(jnp.abs(rec_f - ref_rec_f32))))

    print("KERNEL_OK")
</pallas_src>

<mosaic_0001>
module attributes {stable_mosaic.version = 11 : i64} {
  func.func @kernel(%arg0: i32, %arg1: memref<8x256xi32, #tpu.memory_space<vmem>>, %arg2: memref<8x256x128xbf16, #tpu.memory_space<vmem>>, %arg3: memref<1x128xf32, #tpu.memory_space<vmem>>, %arg4: memref<128x128xbf16, #tpu.memory_space<vmem>>, %arg5: memref<1x128xf32, #tpu.memory_space<vmem>>, %arg6: memref<8x128xbf16, #tpu.memory_space<vmem>>) attributes {dimension_semantics = [#tpu.dimension_semantics<parallel>], iteration_bounds = array<i64: 1>, scalar_prefetch = 0 : i64, scratch_operands = 0 : i64, tpu.core_type = #tpu.core_type<tc>, window_params = [{transform_indices = @transform_0, window_bounds = array<i64: 8, 256>}, {pipeline_mode = #tpu.pipeline_mode<synchronous>, transform_indices = @transform_1, window_bounds = array<i64: 8, 256, 128>}, {pipeline_mode = #tpu.pipeline_mode<synchronous>, transform_indices = @transform_2, window_bounds = array<i64: 1, 128>}, {pipeline_mode = #tpu.pipeline_mode<synchronous>, transform_indices = @transform_3, window_bounds = array<i64: 128, 128>}, {pipeline_mode = #tpu.pipeline_mode<synchronous>, transform_indices = @transform_4, window_bounds = array<i64: 1, 128>}, {transform_indices = @transform_5, window_bounds = array<i64: 8, 128>}]} {
    %c0 = arith.constant 0 : index
    %c0_0 = arith.constant 0 : index
    %0 = vector.load %arg1[%c0, %c0_0] : memref<8x256xi32, #tpu.memory_space<vmem>>, vector<8x256xi32>
    %cst = arith.constant 0.000000e+00 : f32
    %1 = vector.broadcast %cst : f32 to vector<8x128xf32>
    %c0_i32 = arith.constant 0 : i32
    %2 = vector.broadcast %c0_i32 : i32 to vector<8x256xi32>
    %3 = arith.cmpi eq, %0, %2 : vector<8x256xi32>
    %cst_1 = arith.constant 1.000000e+00 : f32
    %cst_2 = arith.constant 0.000000e+00 : f32
    %4 = vector.broadcast %cst_1 : f32 to vector<8x256xf32>
    %5 = vector.broadcast %cst_2 : f32 to vector<8x256xf32>
    %6 = arith.select %3, %4, %5 : vector<8x256xi1>, vector<8x256xf32>
    %7 = arith.truncf %6 : vector<8x256xf32> to vector<8x256xbf16>
    %c0_3 = arith.constant 0 : index
    %c0_4 = arith.constant 0 : index
    %c0_5 = arith.constant 0 : index
    %8 = vector.load %arg2[%c0_3, %c0_4, %c0_5] : memref<8x256x128xbf16, #tpu.memory_space<vmem>>, vector<1x256x128xbf16>
    %9 = vector.shape_cast %8 : vector<1x256x128xbf16> to vector<256x128xbf16>
    %cst_6 = arith.constant dense<0.000000e+00> : vector<8x128xf32>
    %10 = tpu.matmul %7, %9, %cst_6 {dimension_numbers = #tpu.dot_dimension_numbers<[1], [0], [0], [1], [0, 0, 1, 1], [], []>} : vector<8x256xbf16>, vector<256x128xbf16>, vector<8x128xf32> -> vector<8x128xf32>
    %11 = arith.addf %1, %10 : vector<8x128xf32>
    %c1_i32 = arith.constant 1 : i32
    %12 = vector.broadcast %c1_i32 : i32 to vector<8x256xi32>
    %13 = arith.cmpi eq, %0, %12 : vector<8x256xi32>
    %cst_7 = arith.constant 1.000000e+00 : f32
    %cst_8 = arith.constant 0.000000e+00 : f32
    %14 = vector.broadcast %cst_7 : f32 to vector<8x256xf32>
    %15 = vector.broadcast %cst_8 : f32 to vector<8x256xf32>
    %16 = arith.select %13, %14, %15 : vector<8x256xi1>, vector<8x256xf32>
    %17 = arith.truncf %16 : vector<8x256xf32> to vector<8x256xbf16>
    %c1 = arith.constant 1 : index
    %c0_9 = arith.constant 0 : index
    %c0_10 = arith.constant 0 : index
    %18 = vector.load %arg2[%c1, %c0_9, %c0_10] : memref<8x256x128xbf16, #tpu.memory_space<vmem>>, vector<1x256x128xbf16>
    %19 = vector.shape_cast %18 : vector<1x256x128xbf16> to vector<256x128xbf16>
    %cst_11 = arith.constant dense<0.000000e+00> : vector<8x128xf32>
    %20 = tpu.matmul %17, %19, %cst_11 {dimension_numbers = #tpu.dot_dimension_numbers<[1], [0], [0], [1], [0, 0, 1, 1], [], []>} : vector<8x256xbf16>, vector<256x128xbf16>, vector<8x128xf32> -> vector<8x128xf32>
    %21 = arith.addf %11, %20 : vector<8x128xf32>
    %c2_i32 = arith.constant 2 : i32
    %22 = vector.broadcast %c2_i32 : i32 to vector<8x256xi32>
    %23 = arith.cmpi eq, %0, %22 : vector<8x256xi32>
    %cst_12 = arith.constant 1.000000e+00 : f32
    %cst_13 = arith.constant 0.000000e+00 : f32
    %24 = vector.broadcast %cst_12 : f32 to vector<8x256xf32>
    %25 = vector.broadcast %cst_13 : f32 to vector<8x256xf32>
    %26 = arith.select %23, %24, %25 : vector<8x256xi1>, vector<8x256xf32>
    %27 = arith.truncf %26 : vector<8x256xf32> to vector<8x256xbf16>
    %c2 = arith.constant 2 : index
    %c0_14 = arith.constant 0 : index
    %c0_15 = arith.constant 0 : index
    %28 = vector.load %arg2[%c2, %c0_14, %c0_15] : memref<8x256x128xbf16, #tpu.memory_space<vmem>>, vector<1x256x128xbf16>
    %29 = vector.shape_cast %28 : vector<1x256x128xbf16> to vector<256x128xbf16>
    %cst_16 = arith.constant dense<0.000000e+00> : vector<8x128xf32>
    %30 = tpu.matmul %27, %29, %cst_16 {dimension_numbers = #tpu.dot_dimension_numbers<[1], [0], [0], [1], [0, 0, 1, 1], [], []>} : vector<8x256xbf16>, vector<256x128xbf16>, vector<8x128xf32> -> vector<8x128xf32>
    %31 = arith.addf %21, %30 : vector<8x128xf32>
    %c3_i32 = arith.constant 3 : i32
    %32 = vector.broadcast %c3_i32 : i32 to vector<8x256xi32>
    %33 = arith.cmpi eq, %0, %32 : vector<8x256xi32>
    %cst_17 = arith.constant 1.000000e+00 : f32
    %cst_18 = arith.constant 0.000000e+00 : f32
    %34 = vector.broadcast %cst_17 : f32 to vector<8x256xf32>
    %35 = vector.broadcast %cst_18 : f32 to vector<8x256xf32>
    %36 = arith.select %33, %34, %35 : vector<8x256xi1>, vector<8x256xf32>
    %37 = arith.truncf %36 : vector<8x256xf32> to vector<8x256xbf16>
    %c3 = arith.constant 3 : index
    %c0_19 = arith.constant 0 : index
    %c0_20 = arith.constant 0 : index
    %38 = vector.load %arg2[%c3, %c0_19, %c0_20] : memref<8x256x128xbf16, #tpu.memory_space<vmem>>, vector<1x256x128xbf16>
    %39 = vector.shape_cast %38 : vector<1x256x128xbf16> to vector<256x128xbf16>
    %cst_21 = arith.constant dense<0.000000e+00> : vector<8x128xf32>
    %40 = tpu.matmul %37, %39, %cst_21 {dimension_numbers = #tpu.dot_dimension_numbers<[1], [0], [0], [1], [0, 0, 1, 1], [], []>} : vector<8x256xbf16>, vector<256x128xbf16>, vector<8x128xf32> -> vector<8x128xf32>
    %41 = arith.addf %31, %40 : vector<8x128xf32>
    %c4_i32 = arith.constant 4 : i32
    %42 = vector.broadcast %c4_i32 : i32 to vector<8x256xi32>
    %43 = arith.cmpi eq, %0, %42 : vector<8x256xi32>
    %cst_22 = arith.constant 1.000000e+00 : f32
    %cst_23 = arith.constant 0.000000e+00 : f32
    %44 = vector.broadcast %cst_22 : f32 to vector<8x256xf32>
    %45 = vector.broadcast %cst_23 : f32 to vector<8x256xf32>
    %46 = arith.select %43, %44, %45 : vector<8x256xi1>, vector<8x256xf32>
    %47 = arith.truncf %46 : vector<8x256xf32> to vector<8x256xbf16>
    %c4 = arith.constant 4 : index
    %c0_24 = arith.constant 0 : index
    %c0_25 = arith.constant 0 : index
    %48 = vector.load %arg2[%c4, %c0_24, %c0_25] : memref<8x256x128xbf16, #tpu.memory_space<vmem>>, vector<1x256x128xbf16>
    %49 = vector.shape_cast %48 : vector<1x256x128xbf16> to vector<256x128xbf16>
    %cst_26 = arith.constant dense<0.000000e+00> : vector<8x128xf32>
    %50 = tpu.matmul %47, %49, %cst_26 {dimension_numbers = #tpu.dot_dimension_numbers<[1], [0], [0], [1], [0, 0, 1, 1], [], []>} : vector<8x256xbf16>, vector<256x128xbf16>, vector<8x128xf32> -> vector<8x128xf32>
    %51 = arith.addf %41, %50 : vector<8x128xf32>
    %c5_i32 = arith.constant 5 : i32
    %52 = vector.broadcast %c5_i32 : i32 to vector<8x256xi32>
    %53 = arith.cmpi eq, %0, %52 : vector<8x256xi32>
    %cst_27 = arith.constant 1.000000e+00 : f32
    %cst_28 = arith.constant 0.000000e+00 : f32
    %54 = vector.broadcast %cst_27 : f32 to vector<8x256xf32>
    %55 = vector.broadcast %cst_28 : f32 to vector<8x256xf32>
    %56 = arith.select %53, %54, %55 : vector<8x256xi1>, vector<8x256xf32>
    %57 = arith.truncf %56 : vector<8x256xf32> to vector<8x256xbf16>
    %c5 = arith.constant 5 : index
    %c0_29 = arith.constant 0 : index
    %c0_30 = arith.constant 0 : index
    %58 = vector.load %arg2[%c5, %c0_29, %c0_30] : memref<8x256x128xbf16, #tpu.memory_space<vmem>>, vector<1x256x128xbf16>
    %59 = vector.shape_cast %58 : vector<1x256x128xbf16> to vector<256x128xbf16>
    %cst_31 = arith.constant dense<0.000000e+00> : vector<8x128xf32>
    %60 = tpu.matmul %57, %59, %cst_31 {dimension_numbers = #tpu.dot_dimension_numbers<[1], [0], [0], [1], [0, 0, 1, 1], [], []>} : vector<8x256xbf16>, vector<256x128xbf16>, vector<8x128xf32> -> vector<8x128xf32>
    %61 = arith.addf %51, %60 : vector<8x128xf32>
    %c6_i32 = arith.constant 6 : i32
    %62 = vector.broadcast %c6_i32 : i32 to vector<8x256xi32>
    %63 = arith.cmpi eq, %0, %62 : vector<8x256xi32>
    %cst_32 = arith.constant 1.000000e+00 : f32
    %cst_33 = arith.constant 0.000000e+00 : f32
    %64 = vector.broadcast %cst_32 : f32 to vector<8x256xf32>
    %65 = vector.broadcast %cst_33 : f32 to vector<8x256xf32>
    %66 = arith.select %63, %64, %65 : vector<8x256xi1>, vector<8x256xf32>
    %67 = arith.truncf %66 : vector<8x256xf32> to vector<8x256xbf16>
    %c6 = arith.constant 6 : index
    %c0_34 = arith.constant 0 : index
    %c0_35 = arith.constant 0 : index
    %68 = vector.load %arg2[%c6, %c0_34, %c0_35] : memref<8x256x128xbf16, #tpu.memory_space<vmem>>, vector<1x256x128xbf16>
    %69 = vector.shape_cast %68 : vector<1x256x128xbf16> to vector<256x128xbf16>
    %cst_36 = arith.constant dense<0.000000e+00> : vector<8x128xf32>
    %70 = tpu.matmul %67, %69, %cst_36 {dimension_numbers = #tpu.dot_dimension_numbers<[1], [0], [0], [1], [0, 0, 1, 1], [], []>} : vector<8x256xbf16>, vector<256x128xbf16>, vector<8x128xf32> -> vector<8x128xf32>
    %71 = arith.addf %61, %70 : vector<8x128xf32>
    %c7_i32 = arith.constant 7 : i32
    %72 = vector.broadcast %c7_i32 : i32 to vector<8x256xi32>
    %73 = arith.cmpi eq, %0, %72 : vector<8x256xi32>
    %cst_37 = arith.constant 1.000000e+00 : f32
    %cst_38 = arith.constant 0.000000e+00 : f32
    %74 = vector.broadcast %cst_37 : f32 to vector<8x256xf32>
    %75 = vector.broadcast %cst_38 : f32 to vector<8x256xf32>
    %76 = arith.select %73, %74, %75 : vector<8x256xi1>, vector<8x256xf32>
    %77 = arith.truncf %76 : vector<8x256xf32> to vector<8x256xbf16>
    %c7 = arith.constant 7 : index
    %c0_39 = arith.constant 0 : index
    %c0_40 = arith.constant 0 : index
    %78 = vector.load %arg2[%c7, %c0_39, %c0_40] : memref<8x256x128xbf16, #tpu.memory_space<vmem>>, vector<1x256x128xbf16>
    %79 = vector.shape_cast %78 : vector<1x256x128xbf16> to vector<256x128xbf16>
    %cst_41 = arith.constant dense<0.000000e+00> : vector<8x128xf32>
    %80 = tpu.matmul %77, %79, %cst_41 {dimension_numbers = #tpu.dot_dimension_numbers<[1], [0], [0], [1], [0, 0, 1, 1], [], []>} : vector<8x256xbf16>, vector<256x128xbf16>, vector<8x128xf32> -> vector<8x128xf32>
    %81 = arith.addf %71, %80 : vector<8x128xf32>
    %c0_42 = arith.constant 0 : index
    %c0_43 = arith.constant 0 : index
    %82 = vector.load %arg3[%c0_42, %c0_43] : memref<1x128xf32, #tpu.memory_space<vmem>>, vector<1x128xf32>
    %83 = vector.broadcast %82 : vector<1x128xf32> to vector<8x128xf32>
    %84 = arith.addf %81, %83 : vector<8x128xf32>
    %cst_44 = arith.constant 0.000000e+00 : f32
    %85 = vector.broadcast %cst_44 : f32 to vector<8x128xf32>
    %86 = arith.maximumf %84, %85 : vector<8x128xf32>
    %c0_45 = arith.constant 0 : index
    %c0_46 = arith.constant 0 : index
    %87 = vector.load %arg4[%c0_45, %c0_46] : memref<128x128xbf16, #tpu.memory_space<vmem>>, vector<128x128xbf16>
    %c0_47 = arith.constant 0 : index
    %c0_48 = arith.constant 0 : index
    %88 = vector.load %arg5[%c0_47, %c0_48] : memref<1x128xf32, #tpu.memory_space<vmem>>, vector<1x128xf32>
    %89 = arith.truncf %86 : vector<8x128xf32> to vector<8x128xbf16>
    %cst_49 = arith.constant dense<0.000000e+00> : vector<8x128xf32>
    %90 = tpu.matmul %89, %87, %cst_49 {dimension_numbers = #tpu.dot_dimension_numbers<[1], [0], [0], [1], [0, 0, 1, 1], [], []>} : vector<8x128xbf16>, vector<128x128xbf16>, vector<8x128xf32> -> vector<8x128xf32>
    %91 = vector.broadcast %88 : vector<1x128xf32> to vector<8x128xf32>
    %92 = arith.addf %90, %91 : vector<8x128xf32>
    %93 = arith.truncf %92 : vector<8x128xf32> to vector<8x128xbf16>
    %c0_50 = arith.constant 0 : index
    %c0_51 = arith.constant 0 : index
    %94 = vector.load %arg6[%c0_50, %c0_51] : memref<8x128xbf16, #tpu.memory_space<vmem>>, vector<8x128xbf16>
    tpu.vector_store %arg6[%c0_50, %c0_51], %93 {strides = array<i32>} : memref<8x128xbf16, #tpu.memory_space<vmem>>, vector<8x128xbf16>,
    return
  }
  func.func @transform_0(%arg0: i32) -> (i32, i32) {
    %c0_i32 = arith.constant 0 : i32
    %c0_i32_0 = arith.constant 0 : i32
    return %arg0, %c0_i32 : i32, i32
  }
  func.func @transform_1(%arg0: i32) -> (i32, i32, i32) {
    %c0_i32 = arith.constant 0 : i32
    %c0_i32_0 = arith.constant 0 : i32
    %c0_i32_1 = arith.constant 0 : i32
    %c0_i32_2 = arith.constant 0 : i32
    return %c0_i32, %c0_i32_0, %c0_i32_1 : i32, i32, i32
  }
  func.func @transform_2(%arg0: i32) -> (i32, i32) {
    %c0_i32 = arith.constant 0 : i32
    %c0_i32_0 = arith.constant 0 : i32
    %c0_i32_1 = arith.constant 0 : i32
    return %c0_i32, %c0_i32_0 : i32, i32
  }
  func.func @transform_3(%arg0: i32) -> (i32, i32) {
    %c0_i32 = arith.constant 0 : i32
    %c0_i32_0 = arith.constant 0 : i32
    %c0_i32_1 = arith.constant 0 : i32
    return %c0_i32, %c0_i32_0 : i32, i32
  }
  func.func @transform_4(%arg0: i32) -> (i32, i32) {
    %c0_i32 = arith.constant 0 : i32
    %c0_i32_0 = arith.constant 0 : i32
    %c0_i32_1 = arith.constant 0 : i32
    return %c0_i32, %c0_i32_0 : i32, i32
  }
  func.func @transform_5(%arg0: i32) -> (i32, i32) {
    %c0_i32 = arith.constant 0 : i32
    %c0_i32_0 = arith.constant 0 : i32
    return %arg0, %c0_i32 : i32, i32
  }
}

</mosaic_0001>

<bundles_post_ra>
// kernel: tpu_custom_call.1
= control target key start
LH: loop header
LB: loop body
LE: loop exit
PB: predicated region body
PF: predicated region fallthrough
CT: control target
= control target key end

     0   :  { %10 = vsyncpa [#allocation3], 0  ;;  %s2356_s0 = inlined_call_operand.hbm [shape: s32[8,256], index: 0, kind: input, shape index: {}]   ;;  %s2357_s1 = inlined_call_operand.hbm [shape: bf16[8,256,128], index: 1, kind: input, shape index: {}]   ;;  %s2358_s2 = inlined_call_operand.vmem [shape: f32[1,128], index: 2, kind: input, shape index: {}]   ;;  %s2359_s3 = inlined_call_operand.hbm [shape: bf16[128,128], index: 3, kind: input, shape index: {}]   ;;  %s2360_s4 = inlined_call_operand.vmem [shape: f32[1,128], index: 4, kind: input, shape index: {}]   ;;  %s2361_s5 = inlined_call_operand.hbm [shape: bf16[8,128], index: 5, kind: output, shape index: {}]  }
   0x1   :  { %11 = vsyncpa [#allocation6], 0 }
   0x2   :  { %12 = vsyncpa [#allocation4], 0  ;;  %s2221_s18 = smov [#allocation5]   ;;  %s2127_s22 = scalar_lea.hbm %s2357_s1, 16384 }
   0x3   :  { %s28_s19 = sshll.u32 %s2221_s18, 4  ;;  %p2128_p0 = scmp.ne.s32.totalorder %s2357_s1, %s2127_s22  ;;  %s29_s19 = int_to_ptr.vmem [resolvable:$true] %s28_s19 }
   0x4   :  { %p2131_p1 = scmp.lt.u32.totalorder %s2127_s22, %s2357_s1 }
   0x6   :  { %p2133_p2 = pnand %p2131_p1, %p2128_p0 }
   0x8   :  { %2136 = shalt.err (!%p2133_p2)
}
   0x9   :  { %s2137_s27 = scalar_lea.vmem %s29_s19, 16384  ;;  %p2142_p4 = scmp.lt.s32.totalorder %s29_s19, %s29_s19 }
   0xa   :  { %p2138_p3 = scmp.ne.s32.totalorder %s29_s19, %s2137_s27  ;;  %p2143_p5 = scmp.lt.s32.totalorder %s2137_s27, %s2137_s27 }
   0xc   :  { %p2144_p6 = por %p2143_p5, %p2142_p4 }
   0xe   :  { %p2145_p7 = pnand %p2144_p6, %p2138_p3 }
  0x10   :  { %2148 = shalt.err (!%p2145_p7)
}
  0x11   :  { %s2222_s28 = smov 64   ;;  %s2223_s29 = smov 4  }
  0x12   :  { %34 = dma.hbm_to_vmem [thread:$0]  %s2357_s1, 16384, %s29_s19, [#allocation6], %s2222_s28, %s2222_s28, %s2223_s29  }
  0x13   :  { %s2224_s7 = smov [#allocation2]   ;;  %s2225_s9 = smov [#allocation7]  }
  0x14   :  { %s19_s8 = sshll.u32 %s2224_s7, 4  ;;  %s42_s10 = sshll.u32 %s2225_s9, 4  ;;  %s20_s8 = int_to_ptr.vmem [resolvable:$true] %s19_s8  ;;  %s43_s10 = int_to_ptr.vmem [resolvable:$true] %s42_s10 }
  0x15   :  { %s2149_s13 = scalar_lea.hbm %s2356_s0, 256 }
  0x16   :  { %p2150_p8 = scmp.ne.s32.totalorder %s2356_s0, %s2149_s13  ;;  %p2153_p9 = scmp.lt.u32.totalorder %s2149_s13, %s2356_s0 }
  0x18   :  { %p2155_p10 = pnand %p2153_p9, %p2150_p8 }
  0x1a   :  { %2158 = shalt.err (!%p2155_p10)
}
  0x1b   :  { %s2159_s1 = scalar_lea.vmem %s20_s8, 256  ;;  %p2164_p12 = scmp.lt.s32.totalorder %s20_s8, %s20_s8 }
  0x1c   :  { %p2160_p11 = scmp.ne.s32.totalorder %s20_s8, %s2159_s1  ;;  %p2165_p13 = scmp.lt.s32.totalorder %s2159_s1, %s2159_s1 }
  0x1e   :  { %p2166_p0 = por %p2165_p13, %p2164_p12 }
  0x20   :  { %p2167_p1 = pnand %p2166_p0, %p2160_p11 }
  0x22   :  { %2170 = shalt.err (!%p2167_p1)
}
  0x23   :  { %22 = dma.hbm_to_vmem [thread:$0]  %s2356_s0, 256, %s20_s8, [#allocation3]  }
  0x24   :  { %s2171_s22 = scalar_lea.hbm %s2359_s3, 1024 }
  0x25   :  { %p2172_p2 = scmp.ne.s32.totalorder %s2359_s3, %s2171_s22  ;;  %p2175_p3 = scmp.lt.u32.totalorder %s2171_s22, %s2359_s3 }
  0x27   :  { %p2177_p4 = pnand %p2175_p3, %p2172_p2 }
  0x29   :  { %2180 = shalt.err (!%p2177_p4)
}
  0x2a   :  { %s2181_s27 = scalar_lea.vmem %s43_s10, 1024  ;;  %p2186_p6 = scmp.lt.s32.totalorder %s43_s10, %s43_s10 }
  0x2b   :  { %p2182_p5 = scmp.ne.s32.totalorder %s43_s10, %s2181_s27  ;;  %p2187_p7 = scmp.lt.s32.totalorder %s2181_s27, %s2181_s27 }
  0x2d   :  { %p2188_p8 = por %p2187_p7, %p2186_p6 }
  0x2f   :  { %p2189_p9 = pnand %p2188_p8, %p2182_p5 }
  0x31   :  { %2192 = shalt.err (!%p2189_p9)
}
  0x32   :  { %48 = dma.hbm_to_vmem [thread:$0]  %s2359_s3, 1024, %s43_s10, [#allocation6], %s2222_s28, %s2222_s28, %s2223_s29  }
  0x33   :  { %2215 = dma.done.wait [#allocation3], 256  }
  0x34   :  { %2216 = vsyncadd [#allocation3], 4294967040 }
  0x35   :  { %2217 = dma.done.wait [#allocation6], 17408  }
  0x36   :  { %2218 = vsyncadd [#allocation6], 4294949888  ;;  %v1991_v0 = vld [vmem:[#allocation5 + $0xc0] sm:$0xff]   ;;  %v1995_v4 = vld [vmem:[#allocation5 + $0xc8] sm:$0xff]   ;;  %v2226_v35 = vmov 1.0|1.0  }
  0x37   :  { %v1992_v1 = vld [vmem:[#allocation5 + $0x40] sm:$0xff]   ;;  %1777 = vmatprep.subr.bf16.mxu0 %v1991_v0  ;;  %v1996_v5 = vld [vmem:[#allocation5 + $0x48] sm:$0xff]   ;;  %v1999_v8 = vld [vmem:[#allocation5 + $0xd0] sm:$0xff]   ;;  %s2229_s7 = smov [#allocation8]  }
  0x38   :  { %v1993_v2 = vld [vmem:[#allocation5 + $0x80] sm:$0xff]   ;;  %1799 = vmatprep.subr.bf16.mxu1 %v1992_v1  ;;  %v1997_v6 = vld [vmem:[#allocation5 + $0x88] sm:$0xff]   ;;  %v2000_v9 = vld [vmem:[#allocation5 + $0x50] sm:$0xff]   ;;  %s1597_s8 = sshll.u32 %s2229_s7, 4  ;;  %s1598_s8 = int_to_ptr.vmem [resolvable:$true] %s1597_s8 }
  0x39   :  { %v1994_v3 = vld [vmem:[#allocation5] sm:$0xff]   ;;  %1778 = vmatpush3.bf16.msra.mxu0 %v1993_v2  ;;  %v1998_v7 = vld [vmem:[#allocation5 + $0x8] sm:$0xff]   ;;  %v2001_v10 = vld [vmem:[#allocation5 + $0x90] sm:$0xff]   ;;  %p2198_p11 = scmp.lt.s32.totalorder %s1598_s8, %s1598_s8 }
  0x3a   :  { %1800 = vmatpush3.bf16.msra.mxu1 %v1994_v3  ;;  %1779 = vmatprep.subr.bf16.mxu0 %v1995_v4  ;;  %v2002_v11 = vld [vmem:[#allocation5 + $0x10] sm:$0xff]   ;;  %v2003_v12 = vld [vmem:[#allocation5 + $0xd8] sm:$0xff]   ;;  %v2007_v16 = vld [vmem:[#allocation5 + $0xe0] sm:$0xff]  }
  0x3b   :  { %1801 = vmatprep.subr.bf16.mxu1 %v1996_v5  ;;  %v2004_v13 = vld [vmem:[#allocation5 + $0x58] sm:$0xff]   ;;  %v2008_v17 = vld [vmem:[#allocation5 + $0x60] sm:$0xff]   ;;  %v2011_v20 = vld [vmem:[#allocation5 + $0xe8] sm:$0xff]  }
  0x3c   :  { %v2005_v14 = vld [vmem:[#allocation5 + $0x98] sm:$0xff]   ;;  %v2009_v18 = vld [vmem:[#allocation5 + $0xa0] sm:$0xff]   ;;  %v2012_v21 = vld [vmem:[#allocation5 + $0x68] sm:$0xff]  }
  0x3d   :  { %1780 = vmatpush3.bf16.msra.mxu0 %v1997_v6  ;;  %v2006_v15 = vld [vmem:[#allocation5 + $0x18] sm:$0xff]   ;;  %v2010_v19 = vld [vmem:[#allocation5 + $0x20] sm:$0xff]   ;;  %v2013_v22 = vld [vmem:[#allocation5 + $0xa8] sm:$0xff]  }
  0x3e   :  { %1802 = vmatpush3.bf16.msra.mxu1 %v1998_v7  ;;  %1781 = vmatprep.subr.bf16.mxu0 %v1999_v8  ;;  %v2014_v23 = vld [vmem:[#allocation5 + $0x28] sm:$0xff]   ;;  %v2015_v24 = vld [vmem:[#allocation5 + $0xf0] sm:$0xff]   ;;  %v2019_v28 = vld [vmem:[#allocation5 + $0xf8] sm:$0xff]  }
  0x3f   :  { %1803 = vmatprep.subr.bf16.mxu1 %v2000_v9  ;;  %v2016_v25 = vld [vmem:[#allocation5 + $0x70] sm:$0xff]   ;;  %v2020_v29 = vld [vmem:[#allocation5 + $0x78] sm:$0xff]   ;;  %v2023_v34 = vld [vmem:[#allocation5 + $0x140] sm:$0xff]  }
  0x40   :  { %v2017_v26 = vld [vmem:[#allocation5 + $0xb0] sm:$0xff]   ;;  %v2021_v30 = vld [vmem:[#allocation5 + $0xb8] sm:$0xff]   ;;  %v2024_v36 = vld [vmem:[#allocation5 + $0x1c0] sm:$0xff]  }
  0x41   :  { %1782 = vmatpush3.bf16.msra.mxu0 %v2001_v10  ;;  %v2018_v27 = vld [vmem:[#allocation5 + $0x30] sm:$0xff]   ;;  %v2022_v31 = vld [vmem:[#allocation5 + $0x38] sm:$0xff]   ;;  %v2025_v37 = vld [vmem:[#allocation5 + $0x100] sm:$0xff]  }
  0x42   :  { %1804 = vmatpush3.bf16.msra.mxu1 %v2002_v11  ;;  %1783 = vmatprep.subr.bf16.mxu0 %v2003_v12  ;;  %v2302_v32 = vld [vmem:[#allocation2 + $0x8] sm:$0xff]  ;;  %v2304_v33 = vld [vmem:[#allocation2] sm:$0xff]  ;;  %v2026_v38 = vld [vmem:[#allocation5 + $0x180] sm:$0xff]  }
  0x43   :  { %1805 = vmatprep.subr.bf16.mxu1 %v2004_v13  ;;  %vm102_vm0 = vcmp.eq.s32.totalorder %v2302_v32, 1  ;;  %vm64_vm1 = vcmp.eq.s32.totalorder %v2302_v32, 0  ;;  %vm101_vm2 = vcmp.eq.s32.totalorder %v2304_v33, 1  ;;  %vm63_vm4 = vcmp.eq.s32.totalorder %v2304_v33, 0  ;;  %v2027_v39 = vld [vmem:[#allocation5 + $0x148] sm:$0xff]   ;;  %v2031_v43 = vld [vmem:[#allocation5 + $0x150] sm:$0xff]  }
  0x44   :  { %vm1623_vm3 = vmpackc.low %vm102_vm0, %vm102_vm0  ;;  %v2028_v40 = vld [vmem:[#allocation5 + $0x1c8] sm:$0xff]   ;;  %v2032_v44 = vld [vmem:[#allocation5 + $0x1d0] sm:$0xff]   ;;  %vm413_vm8 = vcmp.eq.s32.totalorder %v2302_v32, 2  ;;  %vm589_vm9 = vcmp.eq.s32.totalorder %v2302_v32, 3  ;;  %vm412_vm10 = vcmp.eq.s32.totalorder %v2304_v33, 2  ;;  %vm588_vm12 = vcmp.eq.s32.totalorder %v2304_v33, 3 }
  0x45   :  { %1784 = vmatpush3.bf16.msra.mxu0 %v2005_v14  ;;  %1624 = vmatprep.mubr.msk.bf16.mxu0 %vm1623_vm3, %v2226_v35  ;;  %vm1643_vm5 = vmpackc.low %vm64_vm1, %vm64_vm1  ;;  %v2029_v41 = vld [vmem:[#allocation5 + $0x108] sm:$0xff]   ;;  %v2033_v45 = vld [vmem:[#allocation5 + $0x110] sm:$0xff]   ;;  %vm765_vm0 = vcmp.eq.s32.totalorder %v2302_v32, 4  ;;  %vm941_vm1 = vcmp.eq.s32.totalorder %v2302_v32, 5 }
  0x46   :  { %1806 = vmatpush3.bf16.msra.mxu1 %v2006_v15  ;;  %1785 = vmatprep.subr.bf16.mxu0 %v2007_v16  ;;  %vm1625_vm6 = vmpackc.low %vm101_vm2, %vm101_vm2  ;;  %v2030_v42 = vld [vmem:[#allocation5 + $0x188] sm:$0xff]   ;;  %v2034_v46 = vld [vmem:[#allocation5 + $0x190] sm:$0xff]   ;;  %vm764_vm2 = vcmp.eq.s32.totalorder %v2304_v33, 4 }
  0x47   :  { %1807 = vmatprep.subr.bf16.mxu1 %v2008_v17  ;;  %1644 = vmatprep.mubr.msk.bf16.mxu1 %vm1643_vm5, %v2226_v35  ;;  %vm1645_vm7 = vmpackc.low %vm63_vm4, %vm63_vm4  ;;  %v2035_v47 = vld [vmem:[#allocation5 + $0x158] sm:$0xff]   ;;  %v2039_v51 = vld [vmem:[#allocation5 + $0x160] sm:$0xff]   ;;  %vm940_vm4 = vcmp.eq.s32.totalorder %v2304_v33, 5 }
  0x48   :  { %v2036_v48 = vld [vmem:[#allocation5 + $0x1d8] sm:$0xff]   ;;  %v2040_v52 = vld [vmem:[#allocation5 + $0x1e0] sm:$0xff]   ;;  %v2043_v55 = vld [vmem:[#allocation5 + $0x168] sm:$0xff]  }
  0x49   :  { %1786 = vmatpush3.bf16.msra.mxu0 %v2009_v18  ;;  %v2037_v49 = vld [vmem:[#allocation5 + $0x118] sm:$0xff]   ;;  %v2041_v53 = vld [vmem:[#allocation5 + $0x120] sm:$0xff]   ;;  %v2044_v56 = vld [vmem:[#allocation5 + $0x1e8] sm:$0xff]  }
  0x4a   :  { %1808 = vmatpush3.bf16.msra.mxu1 %v2010_v19  ;;  %1787 = vmatprep.subr.bf16.mxu0 %v2011_v20  ;;  %v2038_v50 = vld [vmem:[#allocation5 + $0x198] sm:$0xff]   ;;  %v2042_v54 = vld [vmem:[#allocation5 + $0x1a0] sm:$0xff]   ;;  %v2045_v57 = vld [vmem:[#allocation5 + $0x128] sm:$0xff]  }
  0x4b   :  { %1809 = vmatprep.subr.bf16.mxu1 %v2012_v21  ;;  %v2046_v58 = vld [vmem:[#allocation5 + $0x1a8] sm:$0xff]   ;;  %v2047_v59 = vld [vmem:[#allocation5 + $0x170] sm:$0xff]   ;;  %v2051_v63 = vld [vmem:[#allocation5 + $0x178] sm:$0xff]  }
  0x4c   :  { %v2048_v60 = vld [vmem:[#allocation5 + $0x1f0] sm:$0xff]   ;;  %v2052_v0 = vld [vmem:[#allocation5 + $0x1f8] sm:$0xff]   ;;  %vm1663_vm11 = vmpackc.low %vm413_vm8, %vm413_vm8  ;;  %vm1117_vm8 = vcmp.eq.s32.totalorder %v2302_v32, 6 }
  0x4d   :  { %1788 = vmatpush3.bf16.msra.mxu0 %v2013_v22  ;;  %v2049_v61 = vld [vmem:[#allocation5 + $0x130] sm:$0xff]   ;;  %v2053_v1 = vld [vmem:[#allocation5 + $0x138] sm:$0xff]   ;;  %vm1683_vm13 = vmpackc.low %vm589_vm9, %vm589_vm9  ;;  %vm1293_vm9 = vcmp.eq.s32.totalorder %v2302_v32, 7 }
  0x4e   :  { %1810 = vmatpush3.bf16.msra.mxu1 %v2014_v23  ;;  %1789 = vmatprep.subr.bf16.mxu0 %v2015_v24  ;;  %v2050_v62 = vld [vmem:[#allocation5 + $0x1b0] sm:$0xff]   ;;  %v2054_v2 = vld [vmem:[#allocation5 + $0x1b8] sm:$0xff]   ;;  %vm1665_vm14 = vmpackc.low %vm412_vm10, %vm412_vm10  ;;  %vm1116_vm10 = vcmp.eq.s32.totalorder %v2304_v33, 6 }
  0x4f   :  { %1811 = vmatprep.subr.bf16.mxu1 %v2016_v25  ;;  %v2055_v3 = vld [vmem:[#allocation5 + $0x240] sm:$0xff]   ;;  %vm1685_vm15 = vmpackc.low %vm588_vm12, %vm588_vm12  ;;  %v2059_v7 = vld [vmem:[#allocation5 + $0x248] sm:$0xff]   ;;  %vm1292_vm12 = vcmp.eq.s32.totalorder %v2304_v33, 7 }
  0x50   :  { %v2056_v4 = vld [vmem:[#allocation5 + $0x2c0] sm:$0xff]   ;;  %v2060_v8 = vld [vmem:[#allocation5 + $0x2c8] sm:$0xff]   ;;  %v2063_v11 = vld [vmem:[#allocation5 + $0x250] sm:$0xff]  }
  0x51   :  { %1790 = vmatpush3.bf16.msra.mxu0 %v2017_v26  ;;  %v2057_v5 = vld [vmem:[#allocation5 + $0x200] sm:$0xff]   ;;  %v2061_v9 = vld [vmem:[#allocation5 + $0x208] sm:$0xff]   ;;  %v2064_v12 = vld [vmem:[#allocation5 + $0x2d0] sm:$0xff]  }
  0x52   :  { %1812 = vmatpush3.bf16.msra.mxu1 %v2018_v27  ;;  %1791 = vmatprep.subr.bf16.mxu0 %v2019_v28  ;;  %v2058_v6 = vld [vmem:[#allocation5 + $0x280] sm:$0xff]   ;;  %v2062_v10 = vld [vmem:[#allocation5 + $0x288] sm:$0xff]   ;;  %v2065_v13 = vld [vmem:[#allocation5 + $0x210] sm:$0xff]  }
  0x53   :  { %1813 = vmatprep.subr.bf16.mxu1 %v2020_v29  ;;  %v2066_v14 = vld [vmem:[#allocation5 + $0x290] sm:$0xff]   ;;  %v2067_v15 = vld [vmem:[#allocation5 + $0x258] sm:$0xff]   ;;  %v2071_v19 = vld [vmem:[#allocation5 + $0x260] sm:$0xff]  }
  0x54   :  { %v2068_v16 = vld [vmem:[#allocation5 + $0x2d8] sm:$0xff]   ;;  %v2072_v20 = vld [vmem:[#allocation5 + $0x2e0] sm:$0xff]   ;;  %v2075_v23 = vld [vmem:[#allocation5 + $0x268] sm:$0xff]  }
  0x55   :  { %1792 = vmatpush3.bf16.msra.mxu0 %v2021_v30  ;;  %v2069_v17 = vld [vmem:[#allocation5 + $0x218] sm:$0xff]   ;;  %v2073_v21 = vld [vmem:[#allocation5 + $0x220] sm:$0xff]   ;;  %v2076_v24 = vld [vmem:[#allocation5 + $0x2e8] sm:$0xff]  }
  0x56   :  { %1814 = vmatpush3.bf16.msra.mxu1 %v2022_v31  ;;  %1821 = vmatprep.subr.bf16.mxu0 %v2023_v34  ;;  %v2070_v18 = vld [vmem:[#allocation5 + $0x298] sm:$0xff]   ;;  %v2074_v22 = vld [vmem:[#allocation5 + $0x2a0] sm:$0xff]   ;;  %v2077_v25 = vld [vmem:[#allocation5 + $0x228] sm:$0xff]  }
  0x57   :  { %1843 = vmatprep.subr.bf16.mxu1 %v2024_v36  ;;  %v2078_v26 = vld [vmem:[#allocation5 + $0x2a8] sm:$0xff]   ;;  %v2079_v27 = vld [vmem:[#allocation5 + $0x270] sm:$0xff]   ;;  %v2083_v31 = vld [vmem:[#allocation5 + $0x278] sm:$0xff]  }
  0x58   :  { %1626 = vmatmul.mubr.msk.bf16.vlgmr.msra.gmra.mrb[0].mxu0 %vm1625_vm6, %v2226_v35  ;;  %v2080_v28 = vld [vmem:[#allocation5 + $0x2f0] sm:$0xff]   ;;  %v2084_v34 = vld [vmem:[#allocation5 + $0x2f8] sm:$0xff]   ;;  %vm1703_vm3 = vmpackc.low %vm765_vm0, %vm765_vm0  ;;  %vm2228_vm0 = vmmov 0  }
  0x59   :  { %1646 = vmatmul.mubr.msk.bf16.vlgmr.msra.gmra.mrb[0].mxu1 %vm1645_vm7, %v2226_v35  ;;  %1822 = vmatpush3.bf16.msra.mxu0 %v2025_v37  ;;  %v2081_v29 = vld [vmem:[#allocation5 + $0x230] sm:$0xff]   ;;  %v2085_v36 = vld [vmem:[#allocation5 + $0x238] sm:$0xff]   ;;  %vm1723_vm5 = vmpackc.low %vm941_vm1, %vm941_vm1 }
  0x5a   :  { %1844 = vmatpush3.bf16.msra.mxu1 %v2026_v38  ;;  %1823 = vmatprep.subr.bf16.mxu0 %v2027_v39  ;;  %v2082_v30 = vld [vmem:[#allocation5 + $0x2b0] sm:$0xff]   ;;  %v2086_v37 = vld [vmem:[#allocation5 + $0x2b8] sm:$0xff]   ;;  %v2087_v38 = vld [vmem:[#allocation5 + $0x340] sm:$0xff]  }
  0x5b   :  { %1845 = vmatprep.subr.bf16.mxu1 %v2028_v40  ;;  %1664 = vmatprep.mubr.msk.bf16.mxu0 %vm1663_vm11, %v2226_v35  ;;  %vm1705_vm6 = vmpackc.low %vm764_vm2, %vm764_vm2  ;;  %v2088_v39 = vld [vmem:[#allocation5 + $0x3c0] sm:$0xff]   ;;  %v2121_v33 = vld [vmem:[#allocation7 + $0x10] sm:$0xff]  }
  0x5c   :  { %1684 = vmatprep.mubr.msk.bf16.mxu1 %vm1683_vm13, %v2226_v35  ;;  %vm1725_vm7 = vmpackc.low %vm940_vm4, %vm940_vm4  ;;  %v2089_v40 = vld [vmem:[#allocation5 + $0x300] sm:$0xff]  }
  0x5d   :  { %1824 = vmatpush3.bf16.msra.mxu0 %v2029_v41  ;;  %v2090_v41 = vld [vmem:[#allocation5 + $0x380] sm:$0xff]   ;;  %vm1743_vm11 = vmpackc.low %vm1117_vm8, %vm1117_vm8 }
  0x5e   :  { %1846 = vmatpush3.bf16.msra.mxu1 %v2030_v42  ;;  %1825 = vmatprep.subr.bf16.mxu0 %v2031_v43  ;;  %v2091_v42 = vld [vmem:[#allocation5 + $0x348] sm:$0xff]   ;;  %vm1763_vm13 = vmpackc.low %vm1293_vm9, %vm1293_vm9  ;;  %v2119_v32 = vld [vmem:[#allocation7] sm:$0xff]  }
  0x5f   :  { %1847 = vmatprep.subr.bf16.mxu1 %v2032_v44  ;;  %v2092_v43 = vld [vmem:[#allocation5 + $0x3c8] sm:$0xff]  }
  0x60   :  { %v2093_v44 = vld [vmem:[#allocation5 + $0x308] sm:$0xff]  }
  0x61   :  { %1826 = vmatpush3.bf16.msra.mxu0 %v2033_v45  ;;  %v2094_v45 = vld [vmem:[#allocation5 + $0x388] sm:$0xff]  }
  0x62   :  { %1848 = vmatpush3.bf16.msra.mxu1 %v2034_v46  ;;  %1827 = vmatprep.subr.bf16.mxu0 %v2035_v47  ;;  %v2095_v46 = vld [vmem:[#allocation5 + $0x350] sm:$0xff]  }
  0x63   :  { %1849 = vmatprep.subr.bf16.mxu1 %v2036_v48  ;;  %v2096_v47 = vld [vmem:[#allocation5 + $0x3d0] sm:$0xff]  }
  0x64   :  { %v2097_v48 = vld [vmem:[#allocation5 + $0x310] sm:$0xff]  }
  0x65   :  { %1828 = vmatpush3.bf16.msra.mxu0 %v2037_v49  ;;  %v2098_v49 = vld [vmem:[#allocation5 + $0x390] sm:$0xff]  }
  0x66   :  { %1850 = vmatpush3.bf16.msra.mxu1 %v2038_v50  ;;  %1829 = vmatprep.subr.bf16.mxu0 %v2039_v51  ;;  %v2099_v50 = vld [vmem:[#allocation5 + $0x358] sm:$0xff]  }
  0x67   :  { %1851 = vmatprep.subr.bf16.mxu1 %v2040_v52  ;;  %v2100_v51 = vld [vmem:[#allocation5 + $0x3d8] sm:$0xff]  }
  0x68   :  { %v2101_v52 = vld [vmem:[#allocation5 + $0x318] sm:$0xff]  }
  0x69   :  { %1830 = vmatpush3.bf16.msra.mxu0 %v2041_v53  ;;  %v2102_v53 = vld [vmem:[#allocation5 + $0x398] sm:$0xff]  }
  0x6a   :  { %1852 = vmatpush3.bf16.msra.mxu1 %v2042_v54  ;;  %1831 = vmatprep.subr.bf16.mxu0 %v2043_v55  ;;  %v2103_v54 = vld [vmem:[#allocation5 + $0x360] sm:$0xff]  }
  0x6b   :  { %1853 = vmatprep.subr.bf16.mxu1 %v2044_v56  ;;  %v2104_v55 = vld [vmem:[#allocation5 + $0x3e0] sm:$0xff]  }
  0x6c   :  { %v2105_v56 = vld [vmem:[#allocation5 + $0x320] sm:$0xff]  }
  0x6d   :  { %1832 = vmatpush3.bf16.msra.mxu0 %v2045_v57  ;;  %v2106_v57 = vld [vmem:[#allocation5 + $0x3a0] sm:$0xff]  }
  0x6e   :  { %1854 = vmatpush3.bf16.msra.mxu1 %v2046_v58  ;;  %1833 = vmatprep.subr.bf16.mxu0 %v2047_v59  ;;  %v2107_v58 = vld [vmem:[#allocation5 + $0x368] sm:$0xff]  }
  0x6f   :  { %1855 = vmatprep.subr.bf16.mxu1 %v2048_v60  ;;  %v2108_v59 = vld [vmem:[#allocation5 + $0x3e8] sm:$0xff]  }
  0x70   :  { %v2109_v60 = vld [vmem:[#allocation5 + $0x328] sm:$0xff]  }
  0x71   :  { %1834 = vmatpush3.bf16.msra.mxu0 %v2049_v61  ;;  %v2110_v61 = vld [vmem:[#allocation5 + $0x3a8] sm:$0xff]  }
  0x72   :  { %1856 = vmatpush3.bf16.msra.mxu1 %v2050_v62  ;;  %1835 = vmatprep.subr.bf16.mxu0 %v2051_v63  ;;  %v2111_v62 = vld [vmem:[#allocation5 + $0x370] sm:$0xff]  }
  0x73   :  { %1857 = vmatprep.subr.bf16.mxu1 %v2052_v0  ;;  %v2112_v63 = vld [vmem:[#allocation5 + $0x3f0] sm:$0xff]  }
  0x74   :  { %v2113_v0 = vld [vmem:[#allocation5 + $0x330] sm:$0xff]  }
  0x75   :  { %1836 = vmatpush3.bf16.msra.mxu0 %v2053_v1  ;;  %v2114_v1 = vld [vmem:[#allocation5 + $0x3b0] sm:$0xff]  }
  0x76   :  { %1858 = vmatpush3.bf16.msra.mxu1 %v2054_v2  ;;  %1865 = vmatprep.subr.bf16.mxu0 %v2055_v3  ;;  %v2115_v2 = vld [vmem:[#allocation5 + $0x378] sm:$0xff]  }
  0x77   :  { %1887 = vmatprep.subr.bf16.mxu1 %v2056_v4  ;;  %v2116_v3 = vld [vmem:[#allocation5 + $0x3f8] sm:$0xff]  }
  0x78   :  { %1666 = vmatmul.mubr.msk.bf16.vlgmr.msra.gmra.mrb[4].mxu0 %vm1665_vm14, %v2226_v35  ;;  %v2117_v4 = vld [vmem:[#allocation5 + $0x338] sm:$0xff]   ;;  %vm1745_vm14 = vmpackc.low %vm1116_vm10, %vm1116_vm10 }
  0x79   :  { %1686 = vmatmul.mubr.msk.bf16.vlgmr.msra.gmra.mrb[4].mxu1 %vm1685_vm15, %v2226_v35  ;;  %1866 = vmatpush3.bf16.msra.mxu0 %v2057_v5  ;;  %v2118_v5 = vld [vmem:[#allocation5 + $0x3b8] sm:$0xff]   ;;  %vm1765_vm15 = vmpackc.low %vm1292_vm12, %vm1292_vm12 }
  0x7a   :  { %1888 = vmatpush3.bf16.msra.mxu1 %v2058_v6  ;;  %1867 = vmatprep.subr.bf16.mxu0 %v2059_v7  ;;  %v2227_v6 = vmov 0.0   ;;  %v2120_v7 = vld [vmem:[#allocation7 + $0x8] sm:$0xff]  }
  0x7b   :  { %1889 = vmatprep.subr.bf16.mxu1 %v2060_v8  ;;  %1704 = vmatprep.mubr.msk.bf16.mxu0 %vm1703_vm3, %v2226_v35  ;;  %v2122_v8 = vld [vmem:[#allocation7 + $0x18] sm:$0xff]  }
  0x7c   :  { %1724 = vmatprep.mubr.msk.bf16.mxu1 %vm1723_vm5, %v2226_v35 }
  0x7d   :  { %1868 = vmatpush3.bf16.msra.mxu0 %v2061_v9  ;;  %v2123_v9 = vld [vmem:[#allocation7 + $0x20] sm:$0xff]  }
  0x7e   :  { %1890 = vmatpush3.bf16.msra.mxu1 %v2062_v10  ;;  %1869 = vmatprep.subr.bf16.mxu0 %v2063_v11  ;;  %v2124_v10 = vld [vmem:[#allocation7 + $0x28] sm:$0xff]   ;;  %v2126_v11 = vld [vmem:[#allocation7 + $0x38] sm:$0xff]  }
  0x7f   :  { %1891 = vmatprep.subr.bf16.mxu1 %v2064_v12 }
  0x81   :  { %1870 = vmatpush3.bf16.msra.mxu0 %v2065_v13 }
  0x82   :  { %1892 = vmatpush3.bf16.msra.mxu1 %v2066_v14  ;;  %1871 = vmatprep.subr.bf16.mxu0 %v2067_v15 }
  0x83   :  { %1893 = vmatprep.subr.bf16.mxu1 %v2068_v16 }
  0x85   :  { %1872 = vmatpush3.bf16.msra.mxu0 %v2069_v17 }
  0x86   :  { %1894 = vmatpush3.bf16.msra.mxu1 %v2070_v18  ;;  %1873 = vmatprep.subr.bf16.mxu0 %v2071_v19 }
  0x87   :  { %1895 = vmatprep.subr.bf16.mxu1 %v2072_v20 }
  0x89   :  { %1874 = vmatpush3.bf16.msra.mxu0 %v2073_v21 }
  0x8a   :  { %1896 = vmatpush3.bf16.msra.mxu1 %v2074_v22  ;;  %1875 = vmatprep.subr.bf16.mxu0 %v2075_v23 }
  0x8b   :  { %1897 = vmatprep.subr.bf16.mxu1 %v2076_v24 }
  0x8d   :  { %1876 = vmatpush3.bf16.msra.mxu0 %v2077_v25 }
  0x8e   :  { %1898 = vmatpush3.bf16.msra.mxu1 %v2078_v26  ;;  %1877 = vmatprep.subr.bf16.mxu0 %v2079_v27 }
  0x8f   :  { %1899 = vmatprep.subr.bf16.mxu1 %v2080_v28 }
  0x91   :  { %1878 = vmatpush3.bf16.msra.mxu0 %v2081_v29 }
  0x92   :  { %1900 = vmatpush3.bf16.msra.mxu1 %v2082_v30  ;;  %1879 = vmatprep.subr.bf16.mxu0 %v2083_v31 }
  0x93   :  { %1901 = vmatprep.subr.bf16.mxu1 %v2084_v34 }
  0x95   :  { %1880 = vmatpush3.bf16.msra.mxu0 %v2085_v36 }
  0x96   :  { %1902 = vmatpush3.bf16.msra.mxu1 %v2086_v37  ;;  %1909 = vmatprep.subr.bf16.mxu0 %v2087_v38 }
  0x97   :  { %1931 = vmatprep.subr.bf16.mxu1 %v2088_v39 }
  0x98   :  { %1706 = vmatmul.mubr.msk.bf16.vlgmr.msra.gmra.mrb[8].mxu0 %vm1705_vm6, %v2226_v35 }
  0x99   :  { %1726 = vmatmul.mubr.msk.bf16.vlgmr.msra.gmra.mrb[8].mxu1 %vm1725_vm7, %v2226_v35  ;;  %1910 = vmatpush3.bf16.msra.mxu0 %v2089_v40 }
  0x9a   :  { %1932 = vmatpush3.bf16.msra.mxu1 %v2090_v41  ;;  %1911 = vmatprep.subr.bf16.mxu0 %v2091_v42 }
  0x9b   :  { %1933 = vmatprep.subr.bf16.mxu1 %v2092_v43  ;;  %1744 = vmatprep.mubr.msk.bf16.mxu0 %vm1743_vm11, %v2226_v35 }
  0x9c   :  { %1764 = vmatprep.mubr.msk.bf16.mxu1 %vm1763_vm13, %v2226_v35 }
  0x9d   :  { %1912 = vmatpush3.bf16.msra.mxu0 %v2093_v44 }
  0x9e   :  { %1934 = vmatpush3.bf16.msra.mxu1 %v2094_v45  ;;  %1913 = vmatprep.subr.bf16.mxu0 %v2095_v46 }
  0x9f   :  { %1935 = vmatprep.subr.bf16.mxu1 %v2096_v47 }
  0xa1   :  { %1914 = vmatpush3.bf16.msra.mxu0 %v2097_v48 }
  0xa2   :  { %1936 = vmatpush3.bf16.msra.mxu1 %v2098_v49  ;;  %1915 = vmatprep.subr.bf16.mxu0 %v2099_v50 }
  0xa3   :  { %1937 = vmatprep.subr.bf16.mxu1 %v2100_v51 }
  0xa5   :  { %1916 = vmatpush3.bf16.msra.mxu0 %v2101_v52 }
  0xa6   :  { %1938 = vmatpush3.bf16.msra.mxu1 %v2102_v53  ;;  %1917 = vmatprep.subr.bf16.mxu0 %v2103_v54 }
  0xa7   :  { %1939 = vmatprep.subr.bf16.mxu1 %v2104_v55 }
  0xa9   :  { %1918 = vmatpush3.bf16.msra.mxu0 %v2105_v56 }
  0xaa   :  { %1940 = vmatpush3.bf16.msra.mxu1 %v2106_v57  ;;  %1919 = vmatprep.subr.bf16.mxu0 %v2107_v58 }
  0xab   :  { %1941 = vmatprep.subr.bf16.mxu1 %v2108_v59 }
  0xad   :  { %1920 = vmatpush3.bf16.msra.mxu0 %v2109_v60 }
  0xae   :  { %1942 = vmatpush3.bf16.msra.mxu1 %v2110_v61  ;;  %1921 = vmatprep.subr.bf16.mxu0 %v2111_v62  ;;  %v1767_v61 = vld [vmem:[%s2358_s2] ss:$0 sm:$0xff]  ;;  %s2193_s2 = scalar_lea.vmem %s1598_s8, 64 }
  0xaf   :  { %1943 = vmatprep.subr.bf16.mxu1 %v2112_v63  ;;  %p2194_p10 = scmp.ne.s32.totalorder %s1598_s8, %s2193_s2  ;;  %p2199_p12 = scmp.lt.s32.totalorder %s2193_s2, %s2193_s2 }
  0xb1   :  { %1922 = vmatpush3.bf16.msra.mxu0 %v2113_v0  ;;  %p2200_p13 = por %p2199_p12, %p2198_p11 }
  0xb2   :  { %1944 = vmatpush3.bf16.msra.mxu1 %v2114_v1  ;;  %1923 = vmatprep.subr.bf16.mxu0 %v2115_v2  ;;  %v1768_v2 = vld [vmem:[%s2360_s4] ss:$0 sm:$0xff] }
  0xb3   :  { %1945 = vmatprep.subr.bf16.mxu1 %v2116_v3  ;;  %p2201_p0 = pnand %p2200_p13, %p2194_p10 }
  0xb5   :  { %1924 = vmatpush3.bf16.msra.mxu0 %v2117_v4 }
  0xb6   :  { %1946 = vmatpush3.bf16.msra.mxu1 %v2118_v5  ;;  %1962 = vmatprep.subr.bf16.mxu0 %v2227_v6 }
  0xb8   :  { %1746 = vmatmul.mubr.msk.bf16.vlgmr.msra.gmra.mrb[12].mxu0 %vm1745_vm14, %v2226_v35 }
  0xb9   :  { %1766 = vmatmul.mubr.msk.bf16.vlgmr.msra.gmra.mrb[12].mxu1 %vm1765_vm15, %v2226_v35  ;;  %1963 = vmatpush3.bf16.msra.mxu0 %v2119_v32  ;;  %v2125_v35 = vld [vmem:[#allocation7 + $0x30] sm:$0xff]  }
  0xba   :  { %1964 = vmatprep.subr.bf16.mxu0 %v2227_v6  ;;  %1978 = vmatprep.mubr.msk.bf16.mxu0 %vm2228_vm0, %v2227_v6 }
  0xbd   :  { %1965 = vmatpush3.bf16.msra.mxu0 %v2120_v7 }
  0xbe   :  { %1966 = vmatprep.subr.bf16.mxu0 %v2227_v6 }
  0xc1   :  { %1967 = vmatpush3.bf16.msra.mxu0 %v2121_v33 }
  0xc2   :  { %1968 = vmatprep.subr.bf16.mxu0 %v2227_v6 }
  0xc5   :  { %1969 = vmatpush3.bf16.msra.mxu0 %v2122_v8 }
  0xc6   :  { %1970 = vmatprep.subr.bf16.mxu0 %v2227_v6 }
  0xc9   :  { %1971 = vmatpush3.bf16.msra.mxu0 %v2123_v9 }
  0xca   :  { %1972 = vmatprep.subr.bf16.mxu0 %v2227_v6 }
  0xcd   :  { %1973 = vmatpush3.bf16.msra.mxu0 %v2124_v10 }
  0xce   :  { %1974 = vmatprep.subr.bf16.mxu0 %v2227_v6 }
  0xd1   :  { %1975 = vmatpush3.bf16.msra.mxu0 %v2125_v35 }
  0xd2   :  { %1976 = vmatprep.subr.bf16.mxu0 %v2227_v6 }
  0xd5   :  { %1977 = vmatpush3.bf16.msra.mxu0 %v2126_v11 }
 0x12b   :  { %v1793_v12 = vpop.f32.mrb[0].mxu0 }
 0x12c   :  { %v1815_v13 = vpop.f32.mrb[0].mxu1  ;;  %v1794_v14 = vpop.f32.mrb[1].mxu0 }
 0x12d   :  { %v1795_v15 = vadd.f32 %v1794_v14, %v1793_v12  ;;  %v1816_v16 = vpop.f32.mrb[1].mxu1  ;;  %v1796_v17 = vpop.f32.mrb[2].mxu0 }
 0x12e   :  { %v1817_v18 = vadd.f32 %v1816_v16, %v1815_v13  ;;  %v1818_v19 = vpop.f32.mrb[2].mxu1  ;;  %v1797_v20 = vpop.f32.mrb[3].mxu0 }
 0x12f   :  { %v1819_v21 = vpop.f32.mrb[3].mxu1 }
 0x130   :  { %v407_v22 = vadd.f32 %v1817_v18, %v1795_v15 }
 0x14b   :  { %v1837_v23 = vpop.f32.mrb[4].mxu0 }
 0x14c   :  { %v1859_v24 = vpop.f32.mrb[4].mxu1  ;;  %v1838_v25 = vpop.f32.mrb[5].mxu0 }
 0x14d   :  { %v1839_v26 = vadd.f32 %v1838_v25, %v1837_v23  ;;  %v1860_v27 = vpop.f32.mrb[5].mxu1  ;;  %v1840_v28 = vpop.f32.mrb[6].mxu0 }
 0x14e   :  { %v1861_v29 = vadd.f32 %v1860_v27, %v1859_v24  ;;  %v1862_v30 = vpop.f32.mrb[6].mxu1  ;;  %v1841_v31 = vpop.f32.mrb[7].mxu0 }
 0x14f   :  { %v587_v34 = vadd.f32 %v1839_v26, %v407_v22  ;;  %v1863_v36 = vpop.f32.mrb[7].mxu1 }
 0x151   :  { %v763_v37 = vadd.f32 %v1861_v29, %v587_v34 }
 0x16b   :  { %v1881_v38 = vpop.f32.mrb[8].mxu0 }
 0x16c   :  { %v1903_v39 = vpop.f32.mrb[8].mxu1  ;;  %v1882_v40 = vpop.f32.mrb[9].mxu0 }
 0x16d   :  { %v1883_v41 = vadd.f32 %v1882_v40, %v1881_v38  ;;  %v1904_v42 = vpop.f32.mrb[9].mxu1  ;;  %v1884_v43 = vpop.f32.mrb[10].mxu0 }
 0x16e   :  { %v1905_v44 = vadd.f32 %v1904_v42, %v1903_v39  ;;  %v1906_v45 = vpop.f32.mrb[10].mxu1  ;;  %v1885_v46 = vpop.f32.mrb[11].mxu0 }
 0x16f   :  { %v939_v47 = vadd.f32 %v1883_v41, %v763_v37  ;;  %v1907_v48 = vpop.f32.mrb[11].mxu1 }
 0x171   :  { %v1115_v49 = vadd.f32 %v1905_v44, %v939_v47 }
 0x18b   :  { %v1925_v50 = vpop.f32.mrb[12].mxu0 }
 0x18c   :  { %v1947_v51 = vpop.f32.mrb[12].mxu1  ;;  %v1926_v52 = vpop.f32.mrb[13].mxu0 }
 0x18d   :  { %v1927_v53 = vadd.f32 %v1926_v52, %v1925_v50  ;;  %v1948_v54 = vpop.f32.mrb[13].mxu1  ;;  %v1928_v55 = vpop.f32.mrb[14].mxu0 }
 0x18e   :  { %v1949_v56 = vadd.f32 %v1948_v54, %v1947_v51  ;;  %v1950_v57 = vpop.f32.mrb[14].mxu1  ;;  %v1929_v58 = vpop.f32.mrb[15].mxu0 }
 0x18f   :  { %v1291_v59 = vadd.f32 %v1927_v53, %v1115_v49  ;;  %v1951_v60 = vpop.f32.mrb[15].mxu1 }
 0x191   :  { %v1467_v62 = vadd.f32 %v1949_v56, %v1291_v59 }
 0x193   :  { %v1475_v63 = vadd.f32 %v1767_v61, %v1467_v62 }
 0x195   :  { %v1476_v0 = vmax.f32 %v1475_v63, 0.0 }
 0x197   :  { %v1494_v1 = vpack.c.bf16 %v1476_v0, %v1476_v0 }
 0x199   :  { %1979 = vmatmul.mubr.bf16.vlgmr.msra.gmra.mrb[16].mxu0 %v1494_v1 }
 0x26c   :  { %v1583_v3 = vpop.f32.mrb[16].mxu0 }
 0x26d   :  { %v1584_v4 = vadd.f32 %v1768_v2, %v1583_v3  ;;  %v1980_v5 = vpop.f32.mrb[17].mxu0 }
 0x26e   :  { %v1586_v32 = vpop.f32.mrb[18].mxu0 }
 0x26f   :  { %v1589_v6 = vpack.c.bf16 %v1584_v4, %v1584_v4  ;;  %v1981_v7 = vpop.f32.mrb[19].mxu0 }
 0x271   :  { %1590 = vst [vmem:[#allocation8] sm:$0xf] %v1589_v6 }
 0x272   :  { %2204 = shalt.err (!%p2201_p0)
}
 0x273   :  { %s2205_s4 = scalar_lea.hbm %s2361_s5, 64 }
 0x274   :  { %p2206_p1 = scmp.ne.s32.totalorder %s2361_s5, %s2205_s4  ;;  %p2209_p2 = scmp.lt.u32.totalorder %s2205_s4, %s2361_s5 }
 0x276   :  { %p2211_p3 = pnand %p2209_p2, %p2206_p1 }
 0x278   :  { %2214 = shalt.err (!%p2211_p3)
}
 0x279   :  { %1600 = dma.vmem_to_hbm [thread:$0]  %s1598_s8, 64, %s2361_s5, [#allocation4]  }
 0x27a   :  { %2219 = dma.done.wait [#allocation4], 64  }
 0x27b   :  { %2220 = vsyncadd [#allocation4], 4294967232 }
 0x27c   :  { %1604 = vsyncpa [#allocation3], 1 }
 0x27d   :  { %1605 = vsyncpa [#allocation6], 1 }
 0x27e   :  { %1606 = vsyncpa [#allocation4], 1 }

</bundles_post_ra>
